<compile_context>
chip_gen: v6e
topology: v6e:2x2x1
jax: 0.10.0
libtpu: 0.0.40
codegen_flags: <defaults>
</compile_context>

<pallas_src>
import numpy as np
import jax
import jax.numpy as jnp
from jax.experimental import pallas as pl
from jax.experimental.pallas import tpu as pltpu

_LANES = 128
_PAD_VALUE = -30.0  # softplus(-30) == 0.0 exactly in f32


def _loss_gc_kernel(d_ref, out_ref):
    # d_ref: (bb, rows, 128) f32 signed logit diff; CE per element = softplus(d).
    d = d_ref[...]
    # softplus(d) = max(d, 0) + log(1 + exp(-|d|))
    # (plain log(1+x) kept for guaranteed Mosaic lowering; precision delta vs
    #  log1p is far below the required tolerance here).
    ce = jnp.maximum(d, 0.0) + jnp.log(1.0 + jnp.exp(-jnp.abs(d)))
    # Reduce only the sublane (vertex-row) axis; keep 128 dense lanes per batch
    # row so the store is unmasked.  Final cross-lane reduce happens in XLA.
    out_ref[...] = jnp.sum(ce, axis=1)


def loss_gcon_mesh(pred_gc, target_gc, has_gc):
    """pred_gc: (B, n_verts, 2) float, target_gc: (B, n_verts, 3) int,
    has_gc: (B,) bool.  Returns scalar f32 mean CE over has_gc==True rows.
    Matches torch CrossEntropyLoss(reduction='mean') on the selected rows
    (all-False has_gc -> NaN, same as torch)."""
    B, V, C = pred_gc.shape
    assert C == 2
    rows = pl.cdiv(V, _LANES)
    v_pad = rows * _LANES

    # Batch-block size: single grid step for small B; otherwise 8-row blocks
    # (multiple of the sublane count, and >=2 blocks/core for v7x megacore).
    if B <= 32:
        bb = B
    else:
        bb = 8
    b_pad = pl.cdiv(B, bb) * bb

    # --- wrapper-side fused relayout (one elementwise pass over pred/target) --
    # 2-class CE closed form: ce = softplus(l_other - l_selected).
    logits = pred_gc.astype(jnp.float32)
    diff = logits[..., 1] - logits[..., 0]                      # (B, V)
    tgt = target_gc[..., 0]
    d = jnp.where(tgt == 0, diff, -diff)                        # (B, V)
    # Pad ragged vertex tail and (if any) extra batch rows with a value whose
    # softplus is exactly 0 -> no in-kernel masking needed.
    d = jnp.pad(d, ((0, b_pad - B), (0, v_pad - V)), constant_values=_PAD_VALUE)
    d = d.reshape(b_pad, rows, _LANES)

    partials = pl.pallas_call(
        _loss_gc_kernel,
        out_shape=jax.ShapeDtypeStruct((b_pad, _LANES), jnp.float32),
        grid=(b_pad // bb,),
        in_specs=[pl.BlockSpec((bb, rows, _LANES), lambda i: (i, 0, 0))],
        out_specs=pl.BlockSpec((bb, _LANES), lambda i: (i, 0)),
        compiler_params=pltpu.CompilerParams(
            dimension_semantics=("parallel",)),
    )(d)

    # has_gc masking + normalization outside the kernel (tiny (B,128) fused op).
    mask = jnp.pad(has_gc.astype(jnp.float32), (0, b_pad - B))
    n_active = jnp.sum(has_gc.astype(jnp.float32))
    denom = n_active * jnp.float32(V)
    return jnp.sum(partials * mask[:, None]) / denom


def _reference_loss(pred_gc, target_gc, has_gc):
    """numpy reference mirroring torch CrossEntropyLoss(reduction='mean')."""
    pred = np.asarray(pred_gc, dtype=np.float64)
    tgt = np.asarray(target_gc)[:, :, 0].astype(np.int64)
    mask = np.asarray(has_gc).astype(bool)
    p = pred[mask].reshape(-1, 2)
    t = tgt[mask].reshape(-1)
    m = p.max(axis=1, keepdims=True)
    lse = m[:, 0] + np.log(np.exp(p - m).sum(axis=1))
    ce = lse - p[np.arange(p.shape[0]), t]
    return ce.mean()


if __name__ == "__main__":
    # Default module size n_verts=3889 (not a multiple of 128 -> exercises the
    # padded ragged tail), small batch with a mix of has_gc True/False rows.
    B, n_verts = 4, 3889
    key = jax.random.PRNGKey(0)
    k1, k2, k3 = jax.random.split(key, 3)

    pred_gc = jax.random.normal(k1, (B, n_verts, 2), dtype=jnp.float32)
    labels = jax.random.randint(k2, (B, n_verts), 0, 2, dtype=jnp.int32)
    # target_gc channels: [class, near_opp_vert_ind, near_opp_vert_dist-ish]
    aux = jax.random.randint(k3, (B, n_verts, 2), 0, n_verts, dtype=jnp.int32)
    target_gc = jnp.concatenate([labels[..., None], aux], axis=-1)
    has_gc = jnp.array([True, False, True, True])

    loss_fn = jax.jit(loss_gcon_mesh)
    loss = jax.block_until_ready(loss_fn(pred_gc, target_gc, has_gc))

    ref = _reference_loss(pred_gc, target_gc, has_gc)
    assert np.allclose(float(loss), ref, rtol=1e-4, atol=1e-5), (float(loss), ref)
    print("KERNEL_OK")
</pallas_src>

<mosaic_0001>
module attributes {stable_mosaic.version = 11 : i64} {
  func.func @_loss_gc_kernel(%arg0: i32, %arg1: memref<4x31x128xf32, #tpu.memory_space<vmem>>, %arg2: memref<4x128xf32, #tpu.memory_space<vmem>>) attributes {dimension_semantics = [#tpu.dimension_semantics<parallel>], iteration_bounds = array<i64: 1>, scalar_prefetch = 0 : i64, scratch_operands = 0 : i64, tpu.core_type = #tpu.core_type<tc>, window_params = [{transform_indices = @transform_0, window_bounds = array<i64: 4, 31, 128>}, {transform_indices = @transform_1, window_bounds = array<i64: 4, 128>}]} {
    %c0 = arith.constant 0 : index
    %c0_0 = arith.constant 0 : index
    %c0_1 = arith.constant 0 : index
    %0 = vector.load %arg1[%c0, %c0_0, %c0_1] : memref<4x31x128xf32, #tpu.memory_space<vmem>>, vector<4x31x128xf32>
    %cst = arith.constant 0.000000e+00 : f32
    %1 = vector.broadcast %cst : f32 to vector<4x31x128xf32>
    %2 = arith.maximumf %0, %1 : vector<4x31x128xf32>
    %3 = math.absf %0 : vector<4x31x128xf32>
    %cst_2 = arith.constant 0.000000e+00 : f32
    %4 = vector.broadcast %cst_2 : f32 to vector<4x31x128xf32>
    %5 = arith.subf %4, %3 : vector<4x31x128xf32>
    %6 = math.exp %5 : vector<4x31x128xf32>
    %cst_3 = arith.constant 1.000000e+00 : f32
    %7 = vector.broadcast %cst_3 : f32 to vector<4x31x128xf32>
    %8 = arith.addf %7, %6 : vector<4x31x128xf32>
    %9 = math.log %8 : vector<4x31x128xf32>
    %10 = arith.addf %2, %9 : vector<4x31x128xf32>
    %cst_4 = arith.constant dense<0.000000e+00> : vector<4x128xf32>
    %11 = vector.multi_reduction <add>, %10, %cst_4 [1] : vector<4x31x128xf32> to vector<4x128xf32>
    %c0_5 = arith.constant 0 : index
    %c0_6 = arith.constant 0 : index
    %12 = vector.load %arg2[%c0_5, %c0_6] : memref<4x128xf32, #tpu.memory_space<vmem>>, vector<4x128xf32>
    tpu.vector_store %arg2[%c0_5, %c0_6], %11 {strides = array<i32>} : memref<4x128xf32, #tpu.memory_space<vmem>>, vector<4x128xf32>,
    return
  }
  func.func @transform_0(%arg0: i32) -> (i32, i32, i32) {
    %c0_i32 = arith.constant 0 : i32
    %c0_i32_0 = arith.constant 0 : i32
    %c0_i32_1 = arith.constant 0 : i32
    return %arg0, %c0_i32, %c0_i32_0 : i32, i32, i32
  }
  func.func @transform_1(%arg0: i32) -> (i32, i32) {
    %c0_i32 = arith.constant 0 : i32
    %c0_i32_0 = arith.constant 0 : i32
    return %arg0, %c0_i32 : i32, i32
  }
}

</mosaic_0001>

<bundles_post_ra>
// kernel: loss_gcon_mesh.1
= control target key start
LH: loop header
LB: loop body
LE: loop exit
PB: predicated region body
PF: predicated region fallthrough
CT: control target
= control target key end

     0   :  { %vm170_vm0 = vcmask 1046528   ;;  %vm213_vm1 = vcmask 1041409   ;;  %vm215_vm2 = vcmask 1042434   ;;  %vm217_vm3 = vcmask 1043459   ;;  %s418_s0 = inlined_call_operand.vmem [shape: f32[4,31,128], index: 0, kind: input, shape index: {}]   ;;  %s419_s1 = inlined_call_operand.vmem [shape: f32[4,128], index: 1, kind: output, shape index: {}]  }
   0x1   :  { %v302_v0 = vld [vmem:[%s418_s0] sm:$0xff]  ;;  %v307_v1 = vld [vmem:[%s418_s0 + $0x8] sm:$0xff]  ;;  %v312_v2 = vld [vmem:[%s418_s0 + $0x10] sm:$0xff] }
   0x2   :  { %v317_v3 = vld [vmem:[%s418_s0 + $0x18] sm:$0x7f]  ;;  %v322_v4 = vld [vmem:[%s418_s0 + $0x20] sm:$0xff]  ;;  %v327_v5 = vld [vmem:[%s418_s0 + $0x28] sm:$0xff]  ;;  %v40_v7 = vand.u32 2147483647, %v302_v0 }
   0x3   :  { %v332_v6 = vld [vmem:[%s418_s0 + $0x30] sm:$0xff]  ;;  %v41_v8 = vand.u32 2147483647, %v307_v1  ;;  %v42_v9 = vand.u32 2147483647, %v312_v2  ;;  %v347_v13 = vld [vmem:[%s418_s0 + $0x40] sm:$0xff] }
   0x4   :  { %v43_v10 = vand.u32 2147483647, %v317_v3  ;;  %v341_v11 = vld [vmem:[%s418_s0 + $0x38] sm:$0x7f]  ;;  %v44_v12 = vand.u32 2147483647, %v322_v4 }
   0x5   :  { %v45_v14 = vand.u32 2147483647, %v327_v5  ;;  %v46_v15 = vand.u32 2147483647, %v332_v6  ;;  %v354_v16 = vld [vmem:[%s418_s0 + $0x48] sm:$0xff]  ;;  %v359_v17 = vld [vmem:[%s418_s0 + $0x50] sm:$0xff] }
   0x6   :  { %v56_v18 = vsub.f32 0.0, %v40_v7  ;;  %v57_v19 = vsub.f32 0.0, %v41_v8  ;;  %v58_v20 = vsub.f32 0.0, %v42_v9  ;;  %v364_v21 = vld [vmem:[%s418_s0 + $0x58] sm:$0x7f]  ;;  %v59_v23 = vsub.f32 0.0, %v43_v10 }
   0x7   :  { %v47_v22 = vand.u32 2147483647, %v341_v11  ;;  %v370_v24 = vld [vmem:[%s418_s0 + $0x60] sm:$0xff]  ;;  %v375_v25 = vld [vmem:[%s418_s0 + $0x68] sm:$0xff]  ;;  %v48_v26 = vand.u32 2147483647, %v347_v13 }
   0x8   :  { %v60_v27 = vsub.f32 0.0, %v44_v12  ;;  %v49_v28 = vand.u32 2147483647, %v354_v16  ;;  %v50_v29 = vand.u32 2147483647, %v359_v17  ;;  %v61_v30 = vsub.f32 0.0, %v45_v14 }
   0x9   :  { %v62_v31 = vsub.f32 0.0, %v46_v15  ;;  %v383_v32 = vld [vmem:[%s418_s0 + $0x78] sm:$0x7f]  ;;  %v72_v33 = vmul.f32 1.442695, %v56_v18  ;;  %v388_v36 = vld [vmem:[%s418_s0 + $0x70] sm:$0xff] }
   0xa   :  { %v74_v34 = vmul.f32 1.442695, %v57_v19  ;;  %v76_v35 = vmul.f32 1.442695, %v58_v20  ;;  %v51_v37 = vand.u32 2147483647, %v364_v21 }
   0xb   :  { %v63_v38 = vsub.f32 0.0, %v47_v22  ;;  %v78_v39 = vmul.f32 1.442695, %v59_v23  ;;  %v52_v40 = vand.u32 2147483647, %v370_v24  ;;  %v64_v41 = vsub.f32 0.0, %v48_v26 }
   0xc   :  { %225 = vpow2.f32 %v72_v33  ;;  %v80_v42 = vmul.f32 1.442695, %v60_v27  ;;  %v53_v43 = vand.u32 2147483647, %v375_v25  ;;  %v65_v44 = vsub.f32 0.0, %v49_v28 }
   0xd   :  { %227 = vpow2.f32 %v74_v34  ;;  %v82_v45 = vmul.f32 1.442695, %v61_v30  ;;  %v54_v46 = vand.u32 2147483647, %v388_v36  ;;  %v66_v47 = vsub.f32 0.0, %v50_v29 }
   0xe   :  { %229 = vpow2.f32 %v76_v35  ;;  %v84_v48 = vmul.f32 1.442695, %v62_v31  ;;  %v55_v49 = vand.u32 2147483647, %v383_v32  ;;  %v67_v50 = vsub.f32 0.0, %v51_v37 }
   0xf   :  { %231 = vpow2.f32 %v78_v39  ;;  %v86_v51 = vmul.f32 1.442695, %v63_v38  ;;  %v68_v52 = vsub.f32 0.0, %v52_v40  ;;  %v88_v53 = vmul.f32 1.442695, %v64_v41 }
  0x10   :  { %233 = vpow2.f32 %v80_v42  ;;  %v69_v54 = vsub.f32 0.0, %v53_v43  ;;  %v90_v55 = vmul.f32 1.442695, %v65_v44  ;;  %v70_v56 = vsub.f32 0.0, %v54_v46 }
  0x11   :  { %235 = vpow2.f32 %v82_v45  ;;  %v92_v57 = vmul.f32 1.442695, %v66_v47  ;;  %v71_v58 = vsub.f32 0.0, %v55_v49  ;;  %v94_v59 = vmul.f32 1.442695, %v67_v50 }
  0x12   :  { %237 = vpow2.f32 %v84_v48  ;;  %v96_v60 = vmul.f32 1.442695, %v68_v52  ;;  %v98_v61 = vmul.f32 1.442695, %v69_v54  ;;  %v100_v62 = vmul.f32 1.442695, %v70_v56 }
  0x13   :  { %239 = vpow2.f32 %v86_v51  ;;  %v102_v63 = vmul.f32 1.442695, %v71_v58  ;;  %v24_v46 = vmax.f32 %v302_v0, 0.0  ;;  %v25_v49 = vmax.f32 %v307_v1, 0.0 }
  0x14   :  { %241 = vpow2.f32 %v88_v53  ;;  %v26_v52 = vmax.f32 %v312_v2, 0.0  ;;  %v28_v0 = vmax.f32 %v322_v4, 0.0  ;;  %v29_v1 = vmax.f32 %v327_v5, 0.0 }
  0x15   :  { %243 = vpow2.f32 %v90_v55  ;;  %v27_v55 = vmax.f32 %v317_v3, 0.0  ;;  %v30_v2 = vmax.f32 %v332_v6, 0.0  ;;  %v34_v5 = vmax.f32 %v359_v17, 0.0 }
  0x16   :  { %245 = vpow2.f32 %v92_v57 }
  0x17   :  { %247 = vpow2.f32 %v94_v59 }
  0x18   :  { %249 = vpow2.f32 %v96_v60 }
  0x19   :  { %v226_v7 = vpop.eup %225  ;;  %251 = vpow2.f32 %v98_v61 }
  0x1a   :  { %v228_v8 = vpop.eup %227  ;;  %253 = vpow2.f32 %v100_v62  ;;  %v104_v9 = vadd.f32 1.0, %v226_v7  ;;  %v31_v7 = vmax.f32 %v341_v11, 0.0 }
  0x1b   :  { %v230_v10 = vpop.eup %229  ;;  %255 = vpow2.f32 %v102_v63  ;;  %v105_v12 = vadd.f32 1.0, %v228_v8 }
  0x1c   :  { %v232_v14 = vpop.eup %231  ;;  %v106_v15 = vadd.f32 1.0, %v230_v10  ;;  %257 = vlog2.f32 %v104_v9  ;;  %v32_v10 = vmax.f32 %v347_v13, 0.0  ;;  %v36_v13 = vmax.f32 %v370_v24, 0.0 }
  0x1d   :  { %v234_v18 = vpop.eup %233  ;;  %v107_v19 = vadd.f32 1.0, %v232_v14  ;;  %259 = vlog2.f32 %v105_v12 }
  0x1e   :  { %v236_v20 = vpop.eup %235  ;;  %v108_v22 = vadd.f32 1.0, %v234_v18  ;;  %261 = vlog2.f32 %v106_v15  ;;  %v33_v18 = vmax.f32 %v354_v16, 0.0 }
  0x1f   :  { %v238_v23 = vpop.eup %237  ;;  %v109_v26 = vadd.f32 1.0, %v236_v20  ;;  %263 = vlog2.f32 %v107_v19 }
  0x20   :  { %v240_v27 = vpop.eup %239  ;;  %v110_v28 = vadd.f32 1.0, %v238_v23  ;;  %265 = vlog2.f32 %v108_v22 }
  0x21   :  { %v242_v29 = vpop.eup %241  ;;  %v111_v30 = vadd.f32 1.0, %v240_v27  ;;  %267 = vlog2.f32 %v109_v26 }
  0x22   :  { %v244_v31 = vpop.eup %243  ;;  %v112_v33 = vadd.f32 1.0, %v242_v29  ;;  %269 = vlog2.f32 %v110_v28  ;;  %v35_v28 = vmax.f32 %v364_v21, 0.0 }
  0x23   :  { %v246_v34 = vpop.eup %245  ;;  %v113_v35 = vadd.f32 1.0, %v244_v31  ;;  %271 = vlog2.f32 %v111_v30 }
  0x24   :  { %v248_v37 = vpop.eup %247  ;;  %v114_v38 = vadd.f32 1.0, %v246_v34  ;;  %273 = vlog2.f32 %v112_v33 }
  0x25   :  { %v250_v39 = vpop.eup %249  ;;  %v115_v40 = vadd.f32 1.0, %v248_v37  ;;  %275 = vlog2.f32 %v113_v35  ;;  %v37_v37 = vmax.f32 %v375_v25, 0.0 }
  0x26   :  { %v252_v41 = vpop.eup %251  ;;  %v116_v42 = vadd.f32 1.0, %v250_v39  ;;  %277 = vlog2.f32 %v114_v38  ;;  %v38_v38 = vmax.f32 %v388_v36, 0.0 }
  0x27   :  { %v254_v43 = vpop.eup %253  ;;  %v117_v44 = vadd.f32 1.0, %v252_v41  ;;  %279 = vlog2.f32 %v115_v40 }
  0x28   :  { %v256_v45 = vpop.eup %255  ;;  %v118_v47 = vadd.f32 1.0, %v254_v43  ;;  %281 = vlog2.f32 %v116_v42 }
  0x29   :  { %v258_v48 = vpop.eup %257  ;;  %v119_v50 = vadd.f32 1.0, %v256_v45  ;;  %283 = vlog2.f32 %v117_v44  ;;  %v39_v45 = vmax.f32 %v383_v32, 0.0 }
  0x2a   :  { %v260_v51 = vpop.eup %259  ;;  %v121_v53 = vmul.f32 0.6931472, %v258_v48  ;;  %285 = vlog2.f32 %v118_v47 }
  0x2b   :  { %v262_v54 = vpop.eup %261  ;;  %v123_v56 = vmul.f32 0.6931472, %v260_v51  ;;  %287 = vlog2.f32 %v119_v50 }
  0x2c   :  { %v264_v57 = vpop.eup %263  ;;  %v125_v58 = vmul.f32 0.6931472, %v262_v54  ;;  %v152_v59 = vadd.f32 %v121_v53, %v24_v46 }
  0x2d   :  { %v266_v60 = vpop.eup %265  ;;  %v127_v61 = vmul.f32 0.6931472, %v264_v57  ;;  %v153_v62 = vadd.f32 %v123_v56, %v25_v49 }
  0x2e   :  { %v268_v63 = vpop.eup %267  ;;  %v129_v8 = vmul.f32 0.6931472, %v266_v60  ;;  %v154_v3 = vadd.f32 %v125_v58, %v26_v52 }
  0x2f   :  { %v270_v9 = vpop.eup %269  ;;  %v131_v12 = vmul.f32 0.6931472, %v268_v63  ;;  %v155_v4 = vadd.f32 %v127_v61, %v27_v55  ;;  %v168_v14 = vadd.f32 %v153_v62, %v152_v59 }
  0x30   :  { %v272_v15 = vpop.eup %271  ;;  %v133_v19 = vmul.f32 0.6931472, %v270_v9  ;;  %v156_v20 = vadd.f32 %v129_v8, %v28_v0 }
  0x31   :  { %v274_v22 = vpop.eup %273  ;;  %v135_v23 = vmul.f32 0.6931472, %v272_v15  ;;  %v157_v6 = vadd.f32 %v131_v12, %v29_v1  ;;  %v169_v26 = vadd.f32 %v168_v14, %v154_v3  ;;  %v171_v11 = vsel %vm170_vm0, %v155_v4, 0.0 }
  0x32   :  { %v276_v27 = vpop.eup %275  ;;  %v137_v29 = vmul.f32 0.6931472, %v274_v22  ;;  %v158_v30 = vadd.f32 %v133_v19, %v30_v2 }
  0x33   :  { %v278_v31 = vpop.eup %277  ;;  %v139_v33 = vmul.f32 0.6931472, %v276_v27  ;;  %v159_v16 = vadd.f32 %v135_v23, %v31_v7  ;;  %v172_v34 = vadd.f32 %v171_v11, %v169_v26  ;;  %v179_v17 = vadd.f32 %v157_v6, %v156_v20 }
  0x34   :  { %v280_v35 = vpop.eup %279  ;;  %v141_v39 = vmul.f32 0.6931472, %v278_v31  ;;  %v160_v40 = vadd.f32 %v137_v29, %v32_v10 }
  0x35   :  { %v282_v41 = vpop.eup %281  ;;  %v143_v42 = vmul.f32 0.6931472, %v280_v35  ;;  %v161_v43 = vadd.f32 %v139_v33, %v33_v18  ;;  %v173_v21 = vrot.slane %v172_v34, 4  ;;  %v180_v44 = vadd.f32 %v179_v17, %v158_v30 }
  0x36   :  { %v284_v24 = vpop.eup %283  ;;  %v145_v46 = vmul.f32 0.6931472, %v282_v41  ;;  %v162_v47 = vadd.f32 %v141_v39, %v34_v5  ;;  %v181_v48 = vsel %vm170_vm0, %v159_v16, 0.0 }
  0x37   :  { %v286_v49 = vpop.eup %285  ;;  %v147_v50 = vmul.f32 0.6931472, %v284_v24  ;;  %v163_v51 = vadd.f32 %v143_v42, %v35_v28  ;;  %v174_v25 = vadd.f32 %v173_v21, %v172_v34  ;;  %v182_v52 = vadd.f32 %v181_v48, %v180_v44 }
  0x38   :  { %v288_v36 = vpop.eup %287  ;;  %v149_v53 = vmul.f32 0.6931472, %v286_v49  ;;  %v164_v54 = vadd.f32 %v145_v46, %v36_v13  ;;  %v189_v55 = vadd.f32 %v161_v43, %v160_v40 }
  0x39   :  { %v151_v56 = vmul.f32 0.6931472, %v288_v36  ;;  %v165_v57 = vadd.f32 %v147_v50, %v37_v37  ;;  %v175_v0 = vrot.slane %v174_v25, 2  ;;  %v183_v58 = vrot.slane %v182_v52, 4 }
  0x3a   :  { %v166_v59 = vadd.f32 %v149_v53, %v38_v38  ;;  %v190_v60 = vadd.f32 %v189_v55, %v162_v47  ;;  %v191_v32 = vsel %vm170_vm0, %v163_v51, 0.0 }
  0x3b   :  { %v167_v1 = vadd.f32 %v151_v56, %v39_v45  ;;  %v176_v61 = vadd.f32 %v175_v0, %v174_v25  ;;  %v184_v62 = vadd.f32 %v183_v58, %v182_v52  ;;  %v199_v63 = vadd.f32 %v165_v57, %v164_v54 }
  0x3c   :  { %v192_v2 = vadd.f32 %v191_v32, %v190_v60 }
  0x3d   :  { %v185_v7 = vrot.slane %v184_v62, 2  ;;  %v200_v8 = vadd.f32 %v199_v63, %v166_v59  ;;  %v201_v3 = vsel %vm170_vm0, %v167_v1, 0.0  ;;  %v177_v10 = vrot.slane %v176_v61, 1 }
  0x3e   :  { %v193_v9 = vrot.slane %v192_v2, 4 }
  0x3f   :  { %v186_v12 = vadd.f32 %v185_v7, %v184_v62  ;;  %v202_v4 = vadd.f32 %v201_v3, %v200_v8  ;;  %v178_v19 = vadd.f32 %v177_v10, %v176_v61 }
  0x40   :  { %v194_v14 = vadd.f32 %v193_v9, %v192_v2 }
  0x41   :  { %v187_v15 = vrot.slane %v186_v12, 1  ;;  %v203_v18 = vrot.slane %v202_v4, 4 }
  0x42   :  { %v195_v5 = vrot.slane %v194_v14, 2 }
  0x43   :  { %v188_v20 = vadd.f32 %v187_v15, %v186_v12  ;;  %v204_v22 = vadd.f32 %v203_v18, %v202_v4 }
  0x44   :  { %v196_v23 = vadd.f32 %v195_v5, %v194_v14 }
  0x45   :  { %v205_v6 = vrot.slane %v204_v22, 2  ;;  %v214_v27 = vsel %vm213_vm1, %v188_v20, %v178_v19 }
  0x46   :  { %v197_v26 = vrot.slane %v196_v23, 1 }
  0x47   :  { %v206_v11 = vadd.f32 %v205_v6, %v204_v22 }
  0x48   :  { %v198_v28 = vadd.f32 %v197_v26, %v196_v23 }
  0x49   :  { %v207_v13 = vrot.slane %v206_v11, 1 }
  0x4a   :  { %v216_v29 = vsel %vm215_vm2, %v198_v28, %v214_v27 }
  0x4b   :  { %v208_v30 = vadd.f32 %v207_v13, %v206_v11 }
  0x4d   :  { %v218_v31 = vsel %vm217_vm3, %v208_v30, %v216_v29 }
  0x4e   :  { %220 = vst [vmem:[%s419_s1] sm:$0xf] %v218_v31 }

</bundles_post_ra>
